<compile_context>
chip_gen: v7x
topology: tpu7x:2x2x1
jax: 0.10.0
libtpu: 0.0.40
codegen_flags: <defaults>
</compile_context>

<pallas_src>
import jax
import jax.numpy as jnp
from jax.experimental import pallas as pl
from jax.experimental.pallas import tpu as pltpu


def _round_up(n: int, m: int) -> int:
    return ((n + m - 1) // m) * m


def _gmlvq_kernel(x_ref, omega_ref, neg2clT_ref, c_sq_ref, dist_ref):
    """One batch tile of squared GMLVQ distances via the norm expansion.

    dist[b, p] = ||x_b O||^2 + ||c_p O||^2 - 2 (x_b O) . (c_p O)
    with all prototype-side terms precomputed in the wrapper.
    """
    x = x_ref[...]                # (TB, D)  f32
    omega = omega_ref[...]        # (D, L)   f32, grid-invariant
    neg2clT = neg2clT_ref[...]    # (L, Pp)  f32, == -2 * (comps @ Omega).T
    c_sq = c_sq_ref[...]          # (1, Pp)  f32, == ||comps @ Omega||^2 per row

    # Project the data tile into latent space (MXU).
    xl = jnp.dot(x, omega, preferred_element_type=jnp.float32)        # (TB, L)
    # Per-row squared norm (XLU reduce, off the VALU critical path).
    x_sq = jnp.sum(xl * xl, axis=-1, keepdims=True)                   # (TB, 1)
    # Cross term with -2 already folded in; RHS is (K, N) so no relayout (MXU).
    cross = jnp.dot(xl, neg2clT, preferred_element_type=jnp.float32)  # (TB, Pp)

    # Epilogue: two broadcast adds + clamp (cancellation guard) per output vreg.
    dist_ref[...] = jnp.maximum(cross + c_sq + x_sq, 0.0)


def gmlvq_forward(x, components, labels, omega, *, tile_b=1024):
    """Returns (distance, label) like the PyTorch module's forward()."""
    B, D = x.shape
    P, Dc = components.shape
    Do, L = omega.shape
    assert Dc == D and Do == D

    # --- Hoisted, one-time prototype-side math (tiny: P x D @ D x L). -------
    P_pad = _round_up(P, 128)          # lane-dense output columns (unmasked vst)
    comp_p = (components if P_pad == P
              else jnp.pad(components, ((0, P_pad - P), (0, 0))))
    cl = jnp.dot(comp_p, omega)                      # (P_pad, L)
    neg2clT = jnp.transpose(-2.0 * cl)               # (L, P_pad), MXU-ready (K, N)
    c_sq = jnp.sum(cl * cl, axis=-1)[None, :]        # (1, P_pad)

    # --- Batch tiling: large tiles; keep >= 2 grid steps when splittable so
    #     "parallel" actually feeds both TensorCores on v7x. -----------------
    B8 = _round_up(max(B, 1), 8)
    tb = min(tile_b, B8)
    if pl.cdiv(B8, tb) < 2 and B8 >= 16:
        tb = _round_up(pl.cdiv(B8, 2), 8)
    num_tiles = pl.cdiv(B, tb)

    flops = (2 * B * D * L              # x @ Omega
             + 2 * B * L                # row norms
             + 2 * B * L * P_pad        # cross matmul
             + 3 * B * P_pad)           # epilogue adds + clamp
    bytes_accessed = 4 * (B * D + D * L + L * P_pad + P_pad + B * P_pad)

    dist_padded = pl.pallas_call(
        _gmlvq_kernel,
        out_shape=jax.ShapeDtypeStruct((B, P_pad), jnp.float32),
        grid=(num_tiles,),
        in_specs=[
            # Streamed batch tile (boundary block masked for ragged B).
            pl.BlockSpec((tb, D), lambda i: (i, 0),
                         memory_space=pltpu.MemorySpace.VMEM),
            # Grid-invariant operands (a few KiB after hoisting), VMEM-resident.
            pl.BlockSpec((D, L), lambda i: (0, 0),
                         memory_space=pltpu.MemorySpace.VMEM),
            pl.BlockSpec((L, P_pad), lambda i: (0, 0),
                         memory_space=pltpu.MemorySpace.VMEM),
            pl.BlockSpec((1, P_pad), lambda i: (0, 0),
                         memory_space=pltpu.MemorySpace.VMEM),
        ],
        out_specs=pl.BlockSpec((tb, P_pad), lambda i: (i, 0),
                               memory_space=pltpu.MemorySpace.VMEM),
        compiler_params=pltpu.CompilerParams(
            dimension_semantics=("parallel",)),
        cost_estimate=pl.CostEstimate(
            flops=flops, transcendentals=0, bytes_accessed=bytes_accessed),
    )(x, omega, neg2clT, c_sq)

    # No-op when P is already a multiple of 128.
    dist = dist_padded if P_pad == P else dist_padded[:, :P]
    return dist, labels


def gmlvq_reference(x, components, omega):
    """Pure-JAX reference of the PyTorch forward (for correctness check)."""
    diff = x[:, None, :] - components[None, :, :]          # (B, P, D)
    latent = jnp.einsum("bpd,dl->bpl", diff, omega)        # (B, P, L)
    return jnp.sum(latent ** 2, axis=-1)                   # (B, P)


if __name__ == "__main__":
    key = jax.random.PRNGKey(0)
    kx, kc, ko = jax.random.split(key, 3)

    # Shapes implied by the module: distribution=[5, 5] -> 2 classes x 5
    # prototypes = 10 components; Omega(5, 5) -> feature dim D=5, latent L=5.
    B, D, L = 8, 5, 5
    protos_per_class, n_classes = 5, 2
    P = protos_per_class * n_classes

    x = jax.random.normal(kx, (B, D), dtype=jnp.float32)

    # Deterministic synthetic "SMCI(data, noise=0.1)"-style init:
    # per-class offset (stand-in for stratified class means) + small noise.
    class_offsets = jnp.repeat(
        jnp.arange(n_classes, dtype=jnp.float32), protos_per_class
    )[:, None]                                             # (P, 1)
    components = class_offsets + 0.1 * jax.random.normal(kc, (P, D), dtype=jnp.float32)
    labels = jnp.repeat(jnp.arange(n_classes, dtype=jnp.int32), protos_per_class)

    # RandomLinearTransformInitializer -> random dense Omega.
    omega = jax.random.normal(ko, (D, L), dtype=jnp.float32)

    # Small (module-sized) check.
    dist, lab = gmlvq_forward(x, components, labels, omega)
    dist = jax.block_until_ready(dist)
    ref = gmlvq_reference(x, components, omega)
    assert dist.shape == (B, P) and lab.shape == (P,)
    assert jnp.allclose(dist, ref, atol=1e-3, rtol=1e-3), "Pallas kernel mismatch (small)"

    # Larger batch: 2-tile "parallel" grid, evenly divisible.
    xb = jax.random.normal(jax.random.PRNGKey(1), (1024, D), dtype=jnp.float32)
    dist_b, _ = gmlvq_forward(xb, components, labels, omega)
    dist_b = jax.block_until_ready(dist_b)
    ref_b = gmlvq_reference(xb, components, omega)
    assert jnp.allclose(dist_b, ref_b, atol=1e-3, rtol=1e-3), "Pallas kernel mismatch (batched)"

    # Non-divisible batch: exercises the masked boundary tile (no jnp.pad of x).
    xr = jax.random.normal(jax.random.PRNGKey(2), (1000, D), dtype=jnp.float32)
    dist_r, _ = gmlvq_forward(xr, components, labels, omega)
    dist_r = jax.block_until_ready(dist_r)
    ref_r = gmlvq_reference(xr, components, omega)
    assert jnp.allclose(dist_r, ref_r, atol=1e-3, rtol=1e-3), "Pallas kernel mismatch (ragged)"

    # TODO(synk): predict()'s wtac (argmin over prototypes + label lookup) is
    # argmin glue over forward()'s output; a fused min/argmin kernel variant
    # would shrink HBM writeback ~13x for the real predict path but is not part
    # of forward() semantics, so it is left in plain JAX.
    print("KERNEL_OK")
</pallas_src>

<mosaic_0001>
module attributes {stable_mosaic.version = 11 : i64} {
  func.func @_gmlvq_kernel(%arg0: i32, %arg1: memref<8x5xf32, #tpu.memory_space<vmem>>, %arg2: memref<5x5xf32, #tpu.memory_space<vmem>>, %arg3: memref<5x128xf32, #tpu.memory_space<vmem>>, %arg4: memref<1x128xf32, #tpu.memory_space<vmem>>, %arg5: memref<8x128xf32, #tpu.memory_space<vmem>>) attributes {dimension_semantics = [#tpu.dimension_semantics<parallel>], iteration_bounds = array<i64: 1>, scalar_prefetch = 0 : i64, scratch_operands = 0 : i64, tpu.core_type = #tpu.core_type<tc>, window_params = [{transform_indices = @transform_0, window_bounds = array<i64: 8, 5>}, {pipeline_mode = #tpu.pipeline_mode<synchronous>, transform_indices = @transform_1, window_bounds = array<i64: 5, 5>}, {pipeline_mode = #tpu.pipeline_mode<synchronous>, transform_indices = @transform_2, window_bounds = array<i64: 5, 128>}, {pipeline_mode = #tpu.pipeline_mode<synchronous>, transform_indices = @transform_3, window_bounds = array<i64: 1, 128>}, {transform_indices = @transform_4, window_bounds = array<i64: 8, 128>}]} {
    %c0 = arith.constant 0 : index
    %c0_0 = arith.constant 0 : index
    %0 = vector.load %arg1[%c0, %c0_0] : memref<8x5xf32, #tpu.memory_space<vmem>>, vector<8x5xf32>
    %c0_1 = arith.constant 0 : index
    %c0_2 = arith.constant 0 : index
    %1 = vector.load %arg2[%c0_1, %c0_2] : memref<5x5xf32, #tpu.memory_space<vmem>>, vector<5x5xf32>
    %c0_3 = arith.constant 0 : index
    %c0_4 = arith.constant 0 : index
    %2 = vector.load %arg3[%c0_3, %c0_4] : memref<5x128xf32, #tpu.memory_space<vmem>>, vector<5x128xf32>
    %c0_5 = arith.constant 0 : index
    %c0_6 = arith.constant 0 : index
    %3 = vector.load %arg4[%c0_5, %c0_6] : memref<1x128xf32, #tpu.memory_space<vmem>>, vector<1x128xf32>
    %cst = arith.constant dense<0.000000e+00> : vector<8x5xf32>
    %4 = tpu.matmul %0, %1, %cst {dimension_numbers = #tpu.dot_dimension_numbers<[1], [0], [0], [1], [0, 0, 1, 1], [], []>} : vector<8x5xf32>, vector<5x5xf32>, vector<8x5xf32> -> vector<8x5xf32>
    %5 = arith.mulf %4, %4 : vector<8x5xf32>
    %cst_7 = arith.constant dense<0.000000e+00> : vector<8xf32>
    %6 = vector.multi_reduction <add>, %5, %cst_7 [1] : vector<8x5xf32> to vector<8xf32>
    %7 = vector.shape_cast %6 : vector<8xf32> to vector<8x1xf32>
    %cst_8 = arith.constant dense<0.000000e+00> : vector<8x128xf32>
    %8 = tpu.matmul %4, %2, %cst_8 {dimension_numbers = #tpu.dot_dimension_numbers<[1], [0], [0], [1], [0, 0, 1, 1], [], []>} : vector<8x5xf32>, vector<5x128xf32>, vector<8x128xf32> -> vector<8x128xf32>
    %9 = vector.broadcast %3 : vector<1x128xf32> to vector<8x128xf32>
    %10 = arith.addf %8, %9 : vector<8x128xf32>
    %11 = vector.broadcast %7 : vector<8x1xf32> to vector<8x128xf32>
    %12 = arith.addf %10, %11 : vector<8x128xf32>
    %cst_9 = arith.constant 0.000000e+00 : f32
    %13 = vector.broadcast %cst_9 : f32 to vector<8x128xf32>
    %14 = arith.maximumf %12, %13 : vector<8x128xf32>
    %c0_10 = arith.constant 0 : index
    %c0_11 = arith.constant 0 : index
    %15 = vector.load %arg5[%c0_10, %c0_11] : memref<8x128xf32, #tpu.memory_space<vmem>>, vector<8x128xf32>
    tpu.vector_store %arg5[%c0_10, %c0_11], %14 {strides = array<i32>} : memref<8x128xf32, #tpu.memory_space<vmem>>, vector<8x128xf32>,
    return
  }
  func.func @transform_0(%arg0: i32) -> (i32, i32) {
    %c0_i32 = arith.constant 0 : i32
    %c0_i32_0 = arith.constant 0 : i32
    return %arg0, %c0_i32 : i32, i32
  }
  func.func @transform_1(%arg0: i32) -> (i32, i32) {
    %c0_i32 = arith.constant 0 : i32
    %c0_i32_0 = arith.constant 0 : i32
    %c0_i32_1 = arith.constant 0 : i32
    return %c0_i32, %c0_i32_0 : i32, i32
  }
  func.func @transform_2(%arg0: i32) -> (i32, i32) {
    %c0_i32 = arith.constant 0 : i32
    %c0_i32_0 = arith.constant 0 : i32
    %c0_i32_1 = arith.constant 0 : i32
    return %c0_i32, %c0_i32_0 : i32, i32
  }
  func.func @transform_3(%arg0: i32) -> (i32, i32) {
    %c0_i32 = arith.constant 0 : i32
    %c0_i32_0 = arith.constant 0 : i32
    %c0_i32_1 = arith.constant 0 : i32
    return %c0_i32, %c0_i32_0 : i32, i32
  }
  func.func @transform_4(%arg0: i32) -> (i32, i32) {
    %c0_i32 = arith.constant 0 : i32
    %c0_i32_0 = arith.constant 0 : i32
    return %arg0, %c0_i32 : i32, i32
  }
}

</mosaic_0001>

<bundles_post_ra>
// kernel: tpu_custom_call.1
= control target key start
LH: loop header
LB: loop body
LE: loop exit
PB: predicated region body
PF: predicated region fallthrough
CT: control target
= control target key end

     0   :  { %9 = vsyncpa [#allocation3], 0  ;;  %s441_s0 = inlined_call_operand.hbm [shape: f32[8,5], index: 0, kind: input, shape index: {}]   ;;  %s442_s1 = inlined_call_operand.hbm [shape: f32[5,5], index: 1, kind: input, shape index: {}]   ;;  %s443_s2 = inlined_call_operand.hbm [shape: f32[5,128], index: 2, kind: input, shape index: {}]   ;;  %s444_s3 = inlined_call_operand.vmem [shape: f32[1,128], index: 3, kind: input, shape index: {}]   ;;  %s445_s4 = inlined_call_operand.hbm [shape: f32[8,128], index: 4, kind: output, shape index: {}]  }
   0x1   :  { %10 = vsyncpa [#allocation6], 0 }
   0x2   :  { %11 = vsyncpa [#allocation4], 0  ;;  %s359_s15 = smov [#allocation5]   ;;  %s360_s17 = smov [#allocation2]  }
   0x3   :  { %s28_s16 = sshll.u32 %s359_s15, 4  ;;  %s18_s18 = sshll.u32 %s360_s17, 4  ;;  %s29_s16 = int_to_ptr.vmem [resolvable:$true] %s28_s16  ;;  %s19_s18 = int_to_ptr.vmem [resolvable:$true] %s18_s18 }
   0x4   :  { %s265_s21 = scalar_lea.hbm %s442_s1, 128 }
   0x5   :  { %p266_p0 = scmp.ne.s32.totalorder %s442_s1, %s265_s21  ;;  %p269_p1 = scmp.lt.u32.totalorder %s265_s21, %s442_s1 }
   0x7   :  { %p271_p2 = pnand %p269_p1, %p266_p0 }
   0x9   :  { %274 = shalt.err (!%p271_p2)
}
   0xa   :  { %s275_s26 = scalar_lea.vmem %s29_s16, 128  ;;  %p280_p4 = scmp.lt.s32.totalorder %s29_s16, %s29_s16 }
   0xb   :  { %p276_p3 = scmp.ne.s32.totalorder %s29_s16, %s275_s26  ;;  %p281_p5 = scmp.lt.s32.totalorder %s275_s26, %s275_s26 }
   0xd   :  { %p282_p6 = por %p281_p5, %p280_p4 }
   0xf   :  { %p283_p7 = pnand %p282_p6, %p276_p3 }
  0x11   :  { %286 = shalt.err (!%p283_p7)
}
  0x12   :  { %31 = dma.hbm_to_vmem [thread:$0]  %s442_s1, 128, %s29_s16, [#allocation6]  }
  0x13   :  { %s287_s5 = scalar_lea.hbm %s441_s0, 128 }
  0x14   :  { %p288_p8 = scmp.ne.s32.totalorder %s441_s0, %s287_s5  ;;  %p291_p9 = scmp.lt.u32.totalorder %s287_s5, %s441_s0 }
  0x16   :  { %p293_p10 = pnand %p291_p9, %p288_p8 }
  0x18   :  { %296 = shalt.err (!%p293_p10)
}
  0x19   :  { %s297_s10 = scalar_lea.vmem %s19_s18, 128  ;;  %p302_p12 = scmp.lt.s32.totalorder %s19_s18, %s19_s18 }
  0x1a   :  { %p298_p11 = scmp.ne.s32.totalorder %s19_s18, %s297_s10  ;;  %p303_p13 = scmp.lt.s32.totalorder %s297_s10, %s297_s10 }
  0x1c   :  { %p304_p0 = por %p303_p13, %p302_p12 }
  0x1e   :  { %p305_p1 = pnand %p304_p0, %p298_p11 }
  0x20   :  { %308 = shalt.err (!%p305_p1)
}
  0x21   :  { %21 = dma.hbm_to_vmem [thread:$0]  %s441_s0, 128, %s19_s18, [#allocation3]  }
  0x22   :  { %s361_s12 = smov [#allocation7]   ;;  %s309_s16 = scalar_lea.hbm %s443_s2, 128 }
  0x23   :  { %s38_s13 = sshll.u32 %s361_s12, 4  ;;  %p310_p2 = scmp.ne.s32.totalorder %s443_s2, %s309_s16  ;;  %s39_s13 = int_to_ptr.vmem [resolvable:$true] %s38_s13 }
  0x24   :  { %p313_p3 = scmp.lt.u32.totalorder %s309_s16, %s443_s2 }
  0x26   :  { %p315_p4 = pnand %p313_p3, %p310_p2 }
  0x28   :  { %318 = shalt.err (!%p315_p4)
}
  0x29   :  { %s319_s22 = scalar_lea.vmem %s39_s13, 128  ;;  %p324_p6 = scmp.lt.s32.totalorder %s39_s13, %s39_s13 }
  0x2a   :  { %p320_p5 = scmp.ne.s32.totalorder %s39_s13, %s319_s22  ;;  %p325_p7 = scmp.lt.s32.totalorder %s319_s22, %s319_s22 }
  0x2c   :  { %p326_p8 = por %p325_p7, %p324_p6 }
  0x2e   :  { %p327_p9 = pnand %p326_p8, %p320_p5 }
  0x30   :  { %330 = shalt.err (!%p327_p9)
}
  0x31   :  { %41 = dma.hbm_to_vmem [thread:$0]  %s443_s2, 128, %s39_s13, [#allocation6]  }
  0x32   :  { %353 = dma.done.wait [#allocation3], 128  }
  0x33   :  { %354 = vsyncadd [#allocation3], 4294967168 }
  0x34   :  { %355 = dma.done.wait [#allocation6], 256  }
  0x35   :  { %356 = vsyncadd [#allocation6], 4294967040  ;;  %v362_v0 = vmov 0.0   ;;  %vm363_vm0 = vmmov 0   ;;  %vm61_vm1 = vcmask 1044480   ;;  %vm57_vm2 = vcmask 39936  }
  0x36   :  { %249 = vmatprep.subr.mxu0 %v362_v0  ;;  %251 = vmatprep.mubr.msk.f32.mxu0 %vm363_vm0, %v362_v0  ;;  %v54_v1 = vld [vmem:[#allocation5] sm:$0x1f]  ;;  %v53_v2 = vld [vmem:[#allocation2] sm:$0xff]  ;;  %v55_v3 = vld [vmem:[#allocation7] sm:$0x1f]  ;;  %s364_s24 = smov [#allocation8]  }
  0x37   :  { %254 = vmatprep.subr.mxu1 %v362_v0  ;;  %256 = vmatprep.mubr.msk.f32.mxu1 %vm363_vm0, %v362_v0  ;;  %v242_v8 = vld [vmem:[%s444_s3] ss:$0 sm:$0xff]  ;;  %s230_s25 = sshll.u32 %s364_s24, 4  ;;  %s231_s25 = int_to_ptr.vmem [resolvable:$true] %s230_s25 }
  0x38   :  { %250 = vmatpush3.msk.msra.mxu0 %vm61_vm1, %v54_v1  ;;  %255 = vmatpush3.msk.msra.mxu1 %vm61_vm1, %v55_v3  ;;  %s331_s26 = scalar_lea.vmem %s231_s25, 128  ;;  %p336_p11 = scmp.lt.s32.totalorder %s231_s25, %s231_s25 }
  0x39   :  { %252 = vmatmul.mubr.msk.f32.vlgmr.msra.gmra.mrb[0].mxu0 %vm57_vm2, %v53_v2  ;;  %p332_p10 = scmp.ne.s32.totalorder %s231_s25, %s331_s26  ;;  %p337_p12 = scmp.lt.s32.totalorder %s331_s26, %s331_s26 }
  0x3b   :  { %p338_p13 = por %p337_p12, %p336_p11 }
  0x3d   :  { %p339_p0 = pnand %p338_p13, %p332_p10 }
 0x10c   :  { %v131_v4 = vpop.f32.mrb[0].mxu0 }
 0x10d   :  { %v253_v5 = vpop.f32.mrb[1].mxu0  ;;  %257 = vmatmul.mubr.msk.f32.vlgmr.msra.gmra.mrb[0].mxu1 %vm57_vm2, %v131_v4  ;;  %v135_v6 = vmul.f32 %v131_v4, %v131_v4 }
 0x10f   :  { %v136_v7 = vsel %vm57_vm2, %v135_v6, 0.0 }
 0x110   :  { %137 = vadd.xlane.f32.xlu0 %v136_v7 }
 0x19d   :  { %v138_v12 = vpop.xlane.xlu0 %137 }
 0x1e0   :  { %v217_v9 = vpop.f32.mrb[0].mxu1 }
 0x1e1   :  { %v218_v10 = vadd.f32 %v242_v8, %v217_v9  ;;  %v258_v11 = vpop.f32.mrb[1].mxu1 }
 0x1e3   :  { %v221_v13 = vadd.f32 %v218_v10, %v138_v12 }
 0x1e5   :  { %v222_v14 = vmax.f32 %v221_v13, 0.0 }
 0x1e7   :  { %223 = vst [vmem:[#allocation8] sm:$0xff] %v222_v14 }
 0x1e8   :  { %342 = shalt.err (!%p339_p0)
}
 0x1e9   :  { %s343_s3 = scalar_lea.hbm %s445_s4, 128 }
 0x1ea   :  { %p344_p1 = scmp.ne.s32.totalorder %s445_s4, %s343_s3  ;;  %p347_p2 = scmp.lt.u32.totalorder %s343_s3, %s445_s4 }
 0x1ec   :  { %p349_p3 = pnand %p347_p2, %p344_p1 }
 0x1ee   :  { %352 = shalt.err (!%p349_p3)
}
 0x1ef   :  { %233 = dma.vmem_to_hbm [thread:$0]  %s231_s25, 128, %s445_s4, [#allocation4]  }
 0x1f0   :  { %357 = dma.done.wait [#allocation4], 128  }
 0x1f1   :  { %358 = vsyncadd [#allocation4], 4294967168 }
 0x1f2   :  { %237 = vsyncpa [#allocation3], 1 }
 0x1f3   :  { %238 = vsyncpa [#allocation6], 1 }
 0x1f4   :  { %239 = vsyncpa [#allocation4], 1 }

</bundles_post_ra>
